<compile_context>
chip_gen: v7x
topology: tpu7x:2x2x1
jax: 0.10.0
libtpu: 0.0.40
codegen_flags: <defaults>
</compile_context>

<pallas_src>
import functools

import jax
import jax.numpy as jnp
from jax.experimental import pallas as pl
from jax.experimental.pallas import tpu as pltpu


_LANES = 128
_NEG = -1e30  # finite "-inf": exp(_NEG - anything_reasonable) underflows to exactly 0 in f32


def _cdiv(a, b):
    return -(-a // b)


def _round_up(a, b):
    return _cdiv(a, b) * b


def _circle_loss_kernel(sp_ref, sn_ref, mp_ref, lp_ref, mn_ref, ln_ref,
                        lgp_ref, lgn_ref, *, gamma, m, p_len, n_len,
                        tiles_p, tiles_n, steps, tr_p, tr_n):
    c = pl.program_id(0)          # TensorCore partition ("parallel" axis)
    k = pl.program_id(1)          # reduction step ("arbitrary" axis)
    t = c * steps + k             # global tile index handled by this (core, step)

    @pl.when(k == 0)
    def _init():
        mp_ref[...] = jnp.full_like(mp_ref, _NEG)
        mn_ref[...] = jnp.full_like(mn_ref, _NEG)
        lp_ref[...] = jnp.zeros_like(lp_ref)
        ln_ref[...] = jnp.zeros_like(ln_ref)

    def _accumulate(s_ref, lg_ref, m_ref, l_ref, logit_fn, tiles, length, tile_rows):
        tile_elems = tile_rows * _LANES
        # Compile-time: only the edge tile can contain padding / undefined ragged data.
        needs_mask = (length % tile_elems) != 0

        @pl.when(t < tiles)
        def _acc():
            s = s_ref[...].astype(jnp.float32)        # (tile_rows, 128): cast on the VPU
            logits = logit_fn(s)

            # Stash logits in VMEM once; both reduction passes re-read them (no recompute,
            # no register spill for large tiles).  Mask only on the edge tile.
            if needs_mask:
                last = tiles - 1

                @pl.when(t == last)
                def _store_edge():
                    rid = jax.lax.broadcasted_iota(jnp.int32, (tile_rows, _LANES), 0)
                    cid = jax.lax.broadcasted_iota(jnp.int32, (tile_rows, _LANES), 1)
                    gidx = (last * tile_rows + rid) * _LANES + cid
                    lg_ref[...] = jnp.where(gidx < length, logits, _NEG)

                @pl.when(t != last)
                def _store_body():
                    lg_ref[...] = logits
            else:
                lg_ref[...] = logits

            chunks = tile_rows // 8
            # Pass 1: per-(sublane, lane) tile max -- pure VPU leading-axis reduction.
            tile_max = jnp.max(lg_ref[...].reshape(chunks, 8, _LANES), axis=0)   # (8,128)
            m_old = m_ref[...]                                                   # (1,8,128)
            m_new = jnp.maximum(m_old, tile_max)
            # Pass 2: rescale running sums and accumulate exp of this tile.
            l_ref[...] = (l_ref[...] * jnp.exp(m_old - m_new)
                          + jnp.sum(jnp.exp(lg_ref[...].reshape(chunks, 8, _LANES) - m_new),
                                    axis=0, keepdims=True))
            m_ref[...] = m_new

    _accumulate(sp_ref, lgp_ref, mp_ref, lp_ref,
                lambda s: -gamma * jnp.maximum(1.0 + m - s, 0.0) * (s - (1.0 - m)),
                tiles_p, p_len, tr_p)
    _accumulate(sn_ref, lgn_ref, mn_ref, ln_ref,
                lambda s: gamma * jnp.maximum(m + s, 0.0) * (s - m),
                tiles_n, n_len, tr_n)


def _to_slab(x):
    """View a 1-D vector as a (rows, 128) slab in its native dtype.

    The reshape is a bitcast when len % 128 == 0; otherwise only a <=127-element tail pad
    is added (one small copy), never a full tiles*tile_rows*128 pad.
    """
    n = int(x.shape[0])
    rows = _cdiv(n, _LANES)
    padded = rows * _LANES
    if padded != n:
        x = jnp.pad(x, (0, padded - n))
    return x.reshape(rows, _LANES), rows


def _lse_from_partials(m_vec, l_vec):
    """Collapse per-core (8,128) online-LSE partials into one scalar logsumexp."""
    mf = m_vec.reshape(m_vec.shape[0], -1)
    lf = l_vec.reshape(l_vec.shape[0], -1)
    gm = jnp.max(mf, axis=1)                                # (cores,)
    gl = jnp.sum(lf * jnp.exp(mf - gm[:, None]), axis=1)    # (cores,)
    lse = gm + jnp.log(gl)                                  # idle core -> effectively -inf
    cm = jnp.max(lse)
    return cm + jnp.log(jnp.sum(jnp.exp(lse - cm)))


def _circle_loss_ref(s_p, s_n, gamma, m):
    """Pure-JAX reference mirroring the PyTorch module (also the small-input fast path)."""
    s_p = s_p.astype(jnp.float32)
    s_n = s_n.astype(jnp.float32)
    alpha_p = jnp.maximum(1.0 + m - s_p, 0.0)
    alpha_n = jnp.maximum(m + s_n, 0.0)
    logit_p = -gamma * alpha_p * (s_p - (1.0 - m))
    logit_n = gamma * alpha_n * (s_n - m)
    z = (jax.scipy.special.logsumexp(logit_p, axis=0)
         + jax.scipy.special.logsumexp(logit_n, axis=0))
    return jax.nn.softplus(z)


def circle_loss(s_p, s_n, gamma, m, *, max_tile_rows=1024, min_kernel_elems=16384,
                num_partitions=2):
    """Pallas TPU implementation of CircleLoss.forward for 1-D s_p / s_n."""
    assert s_p.ndim == 1 and s_n.ndim == 1
    p_len, n_len = int(s_p.shape[0]), int(s_n.shape[0])

    # Small / degenerate inputs: pallas_call launch overhead dominates -> fused XLA path.
    if p_len == 0 or n_len == 0 or (p_len + n_len) < min_kernel_elems:
        return _circle_loss_ref(s_p, s_n, gamma, m)

    max_tile_rows = max(8, _round_up(max_tile_rows, 8))

    sp_slab, rows_p = _to_slab(s_p)
    sn_slab, rows_n = _to_slab(s_n)
    tr_p = min(max_tile_rows, _round_up(rows_p, 8))
    tr_n = min(max_tile_rows, _round_up(rows_n, 8))
    tiles_p = _cdiv(rows_p, tr_p)
    tiles_n = _cdiv(rows_n, tr_n)
    num_tiles = max(tiles_p, tiles_n)
    num_cores = max(1, min(num_partitions, num_tiles))
    steps = _cdiv(num_tiles, num_cores)

    # Edge-tile mask does int32 global-index arithmetic; keep it overflow-free.
    assert tiles_p * tr_p * _LANES < 2**31 and tiles_n * tr_n * _LANES < 2**31

    kernel = functools.partial(
        _circle_loss_kernel,
        gamma=float(gamma), m=float(m),
        p_len=p_len, n_len=n_len,
        tiles_p=tiles_p, tiles_n=tiles_n,
        steps=steps, tr_p=tr_p, tr_n=tr_n)

    out_shape = tuple(jax.ShapeDtypeStruct((num_cores, 8, _LANES), jnp.float32)
                      for _ in range(4))
    out_spec = pl.BlockSpec((1, 8, _LANES), lambda c, k: (c, 0, 0))

    m_p, l_p, m_n, l_n = pl.pallas_call(
        kernel,
        out_shape=out_shape,
        grid=(num_cores, steps),
        in_specs=[
            pl.BlockSpec((tr_p, _LANES),
                         lambda c, k: (jnp.minimum(c * steps + k, tiles_p - 1), 0)),
            pl.BlockSpec((tr_n, _LANES),
                         lambda c, k: (jnp.minimum(c * steps + k, tiles_n - 1), 0)),
        ],
        out_specs=(out_spec, out_spec, out_spec, out_spec),
        scratch_shapes=[pltpu.VMEM((tr_p, _LANES), jnp.float32),
                        pltpu.VMEM((tr_n, _LANES), jnp.float32)],
        compiler_params=pltpu.CompilerParams(
            dimension_semantics=("parallel", "arbitrary")),
    )(sp_slab, sn_slab)

    lse_p = _lse_from_partials(m_p, l_p)
    lse_n = _lse_from_partials(m_n, l_n)
    return jax.nn.softplus(lse_p + lse_n)


if __name__ == "__main__":
    # Deterministic hyper-parameters (module __init__ args).
    gamma = 64.0
    m = 0.25

    key = jax.random.PRNGKey(0)
    keys = jax.random.split(key, 6)

    # 1) Small shapes typical of CircleLoss usage (8 positive / 32 negative similarities);
    #    force the kernel path to exercise the single-tile / single-core configuration.
    s_p = jax.random.uniform(keys[0], (8,), jnp.float32, -1.0, 1.0)
    s_n = jax.random.uniform(keys[1], (32,), jnp.float32, -1.0, 1.0)
    out = circle_loss(s_p, s_n, gamma, m, min_kernel_elems=0)
    jax.block_until_ready(out)
    ref = _circle_loss_ref(s_p, s_n, gamma, m)
    assert jnp.allclose(out, ref, rtol=1e-5, atol=1e-4), (out, ref)

    # 2) Multi-tile streaming, mismatched tile counts, edge-only masking and the two-core
    #    tile split (small tile cap to force several grid steps).
    s_p2 = jax.random.uniform(keys[2], (2048,), jnp.float32, -1.0, 1.0)
    s_n2 = jax.random.uniform(keys[3], (5000,), jnp.float32, -1.0, 1.0)
    out2 = circle_loss(s_p2, s_n2, gamma, m, max_tile_rows=8, min_kernel_elems=0)
    jax.block_until_ready(out2)
    ref2 = _circle_loss_ref(s_p2, s_n2, gamma, m)
    assert jnp.allclose(out2, ref2, rtol=1e-5, atol=1e-4), (out2, ref2)

    # 3) Larger vectors with default tiling: exercises the copy-free 128-multiple path (n),
    #    the minimal tail-pad path (p), a ragged last block, and an idle-core partial.
    s_p3 = jax.random.uniform(keys[4], (100_000,), jnp.float32, -1.0, 1.0)
    s_n3 = jax.random.uniform(keys[5], (262_144,), jnp.float32, -1.0, 1.0)
    out3 = circle_loss(s_p3, s_n3, gamma, m)
    jax.block_until_ready(out3)
    ref3 = _circle_loss_ref(s_p3, s_n3, gamma, m)
    assert jnp.allclose(out3, ref3, rtol=1e-5, atol=1e-4), (out3, ref3)

    print("KERNEL_OK")
</pallas_src>

<mosaic_0001>
module attributes {stable_mosaic.version = 11 : i64} {
  func.func @_circle_loss_kernel(%arg0: i32, %arg1: i32, %arg2: memref<8x128xf32, #tpu.memory_space<vmem>>, %arg3: memref<8x128xf32, #tpu.memory_space<vmem>>, %arg4: memref<1x8x128xf32, #tpu.memory_space<vmem>>, %arg5: memref<1x8x128xf32, #tpu.memory_space<vmem>>, %arg6: memref<1x8x128xf32, #tpu.memory_space<vmem>>, %arg7: memref<1x8x128xf32, #tpu.memory_space<vmem>>, %arg8: memref<8x128xf32, #tpu.memory_space<vmem>>, %arg9: memref<8x128xf32, #tpu.memory_space<vmem>>) attributes {dimension_semantics = [#tpu.dimension_semantics<parallel>, #tpu.dimension_semantics<arbitrary>], iteration_bounds = array<i64: 1, 1>, scalar_prefetch = 0 : i64, scratch_operands = 2 : i64, tpu.core_type = #tpu.core_type<tc>, window_params = [{transform_indices = @transform_0, window_bounds = array<i64: 8, 128>}, {transform_indices = @transform_1, window_bounds = array<i64: 8, 128>}, {transform_indices = @transform_2, window_bounds = array<i64: 1, 8, 128>}, {transform_indices = @transform_3, window_bounds = array<i64: 1, 8, 128>}, {transform_indices = @transform_4, window_bounds = array<i64: 1, 8, 128>}, {transform_indices = @transform_5, window_bounds = array<i64: 1, 8, 128>}]} {
    %c1_i32 = arith.constant 1 : i32
    %0 = arith.muli %arg0, %c1_i32 : i32
    %1 = arith.addi %0, %arg1 : i32
    %c0_i32 = arith.constant 0 : i32
    %2 = arith.cmpi eq, %arg1, %c0_i32 : i32
    %3 = arith.extui %2 : i1 to i32
    %c0_i32_0 = arith.constant 0 : i32
    %4 = arith.cmpi ne, %3, %c0_i32_0 : i32
    scf.if %4 {
      %cst = arith.constant -1.000000e+30 : f32
      %11 = vector.broadcast %cst : f32 to vector<1x8x128xf32>
      %c0 = arith.constant 0 : index
      %c0_5 = arith.constant 0 : index
      %c0_6 = arith.constant 0 : index
      %12 = vector.load %arg4[%c0, %c0_5, %c0_6] : memref<1x8x128xf32, #tpu.memory_space<vmem>>, vector<1x8x128xf32>
      tpu.vector_store %arg4[%c0, %c0_5, %c0_6], %11 {strides = array<i32>} : memref<1x8x128xf32, #tpu.memory_space<vmem>>, vector<1x8x128xf32>,
      %cst_7 = arith.constant -1.000000e+30 : f32
      %13 = vector.broadcast %cst_7 : f32 to vector<1x8x128xf32>
      %c0_8 = arith.constant 0 : index
      %c0_9 = arith.constant 0 : index
      %c0_10 = arith.constant 0 : index
      %14 = vector.load %arg6[%c0_8, %c0_9, %c0_10] : memref<1x8x128xf32, #tpu.memory_space<vmem>>, vector<1x8x128xf32>
      tpu.vector_store %arg6[%c0_8, %c0_9, %c0_10], %13 {strides = array<i32>} : memref<1x8x128xf32, #tpu.memory_space<vmem>>, vector<1x8x128xf32>,
      %cst_11 = arith.constant 0.000000e+00 : f32
      %15 = vector.broadcast %cst_11 : f32 to vector<1x8x128xf32>
      %c0_12 = arith.constant 0 : index
      %c0_13 = arith.constant 0 : index
      %c0_14 = arith.constant 0 : index
      %16 = vector.load %arg5[%c0_12, %c0_13, %c0_14] : memref<1x8x128xf32, #tpu.memory_space<vmem>>, vector<1x8x128xf32>
      tpu.vector_store %arg5[%c0_12, %c0_13, %c0_14], %15 {strides = array<i32>} : memref<1x8x128xf32, #tpu.memory_space<vmem>>, vector<1x8x128xf32>,
      %cst_15 = arith.constant 0.000000e+00 : f32
      %17 = vector.broadcast %cst_15 : f32 to vector<1x8x128xf32>
      %c0_16 = arith.constant 0 : index
      %c0_17 = arith.constant 0 : index
      %c0_18 = arith.constant 0 : index
      %18 = vector.load %arg7[%c0_16, %c0_17, %c0_18] : memref<1x8x128xf32, #tpu.memory_space<vmem>>, vector<1x8x128xf32>
      tpu.vector_store %arg7[%c0_16, %c0_17, %c0_18], %17 {strides = array<i32>} : memref<1x8x128xf32, #tpu.memory_space<vmem>>, vector<1x8x128xf32>,
    } else {
    }
    %c1_i32_1 = arith.constant 1 : i32
    %5 = arith.cmpi slt, %1, %c1_i32_1 : i32
    %6 = arith.extui %5 : i1 to i32
    %c0_i32_2 = arith.constant 0 : i32
    %7 = arith.cmpi ne, %6, %c0_i32_2 : i32
    scf.if %7 {
      %c0 = arith.constant 0 : index
      %c0_5 = arith.constant 0 : index
      %11 = vector.load %arg2[%c0, %c0_5] : memref<8x128xf32, #tpu.memory_space<vmem>>, vector<8x128xf32>
      %cst = arith.constant 1.250000e+00 : f32
      %12 = vector.broadcast %cst : f32 to vector<8x128xf32>
      %13 = arith.subf %12, %11 : vector<8x128xf32>
      %cst_6 = arith.constant 0.000000e+00 : f32
      %14 = vector.broadcast %cst_6 : f32 to vector<8x128xf32>
      %15 = arith.maximumf %13, %14 : vector<8x128xf32>
      %cst_7 = arith.constant -6.400000e+01 : f32
      %16 = vector.broadcast %cst_7 : f32 to vector<8x128xf32>
      %17 = arith.mulf %16, %15 : vector<8x128xf32>
      %cst_8 = arith.constant 7.500000e-01 : f32
      %18 = vector.broadcast %cst_8 : f32 to vector<8x128xf32>
      %19 = arith.subf %11, %18 : vector<8x128xf32>
      %20 = arith.mulf %17, %19 : vector<8x128xf32>
      %c0_i32_9 = arith.constant 0 : i32
      %21 = arith.cmpi eq, %1, %c0_i32_9 : i32
      %22 = arith.extui %21 : i1 to i32
      %c0_i32_10 = arith.constant 0 : i32
      %23 = arith.cmpi ne, %22, %c0_i32_10 : i32
      scf.if %23 {
        %46 = tpu.iota {dimensions = array<i32: 0>} : vector<8x128xi32>
        %47 = tpu.iota {dimensions = array<i32: 1>} : vector<8x128xi32>
        %c0_i32_31 = arith.constant 0 : i32
        %48 = vector.broadcast %c0_i32_31 : i32 to vector<8x128xi32>
        %49 = arith.addi %48, %46 : vector<8x128xi32>
        %c128_i32 = arith.constant 128 : i32
        %50 = vector.broadcast %c128_i32 : i32 to vector<8x128xi32>
        %51 = arith.muli %49, %50 : vector<8x128xi32>
        %52 = arith.addi %51, %47 : vector<8x128xi32>
        %c8_i32 = arith.constant 8 : i32
        %53 = vector.broadcast %c8_i32 : i32 to vector<8x128xi32>
        %54 = arith.cmpi slt, %52, %53 : vector<8x128xi32>
        %cst_32 = arith.constant -1.000000e+30 : f32
        %55 = vector.broadcast %cst_32 : f32 to vector<8x128xf32>
        %56 = arith.select %54, %20, %55 : vector<8x128xi1>, vector<8x128xf32>
        %c0_33 = arith.constant 0 : index
        %c0_34 = arith.constant 0 : index
        %57 = vector.load %arg8[%c0_33, %c0_34] : memref<8x128xf32, #tpu.memory_space<vmem>>, vector<8x128xf32>
        tpu.vector_store %arg8[%c0_33, %c0_34], %56 {strides = array<i32>} : memref<8x128xf32, #tpu.memory_space<vmem>>, vector<8x128xf32>,
      } else {
      }
      %c0_i32_11 = arith.constant 0 : i32
      %24 = arith.cmpi ne, %1, %c0_i32_11 : i32
      %25 = arith.extui %24 : i1 to i32
      %c0_i32_12 = arith.constant 0 : i32
      %26 = arith.cmpi ne, %25, %c0_i32_12 : i32
      scf.if %26 {
        %c0_31 = arith.constant 0 : index
        %c0_32 = arith.constant 0 : index
        %46 = vector.load %arg8[%c0_31, %c0_32] : memref<8x128xf32, #tpu.memory_space<vmem>>, vector<8x128xf32>
        tpu.vector_store %arg8[%c0_31, %c0_32], %20 {strides = array<i32>} : memref<8x128xf32, #tpu.memory_space<vmem>>, vector<8x128xf32>,
      } else {
      }
      %c0_13 = arith.constant 0 : index
      %c0_14 = arith.constant 0 : index
      %27 = vector.load %arg8[%c0_13, %c0_14] : memref<8x128xf32, #tpu.memory_space<vmem>>, vector<8x128xf32>
      %28 = vector.shape_cast %27 : vector<8x128xf32> to vector<1x8x128xf32>
      %cst_15 = arith.constant dense<0xFF800000> : vector<8x128xf32>
      %29 = vector.multi_reduction <maximumf>, %28, %cst_15 [0] : vector<1x8x128xf32> to vector<8x128xf32>
      %c0_16 = arith.constant 0 : index
      %c0_17 = arith.constant 0 : index
      %c0_18 = arith.constant 0 : index
      %30 = vector.load %arg4[%c0_16, %c0_17, %c0_18] : memref<1x8x128xf32, #tpu.memory_space<vmem>>, vector<1x8x128xf32>
      %31 = vector.shape_cast %29 : vector<8x128xf32> to vector<1x8x128xf32>
      %32 = arith.maximumf %30, %31 : vector<1x8x128xf32>
      %c0_19 = arith.constant 0 : index
      %c0_20 = arith.constant 0 : index
      %c0_21 = arith.constant 0 : index
      %33 = vector.load %arg5[%c0_19, %c0_20, %c0_21] : memref<1x8x128xf32, #tpu.memory_space<vmem>>, vector<1x8x128xf32>
      %34 = arith.subf %30, %32 : vector<1x8x128xf32>
      %35 = math.exp %34 : vector<1x8x128xf32>
      %36 = arith.mulf %33, %35 : vector<1x8x128xf32>
      %c0_22 = arith.constant 0 : index
      %c0_23 = arith.constant 0 : index
      %37 = vector.load %arg8[%c0_22, %c0_23] : memref<8x128xf32, #tpu.memory_space<vmem>>, vector<8x128xf32>
      %38 = vector.shape_cast %37 : vector<8x128xf32> to vector<1x8x128xf32>
      %39 = arith.subf %38, %32 : vector<1x8x128xf32>
      %40 = math.exp %39 : vector<1x8x128xf32>
      %cst_24 = arith.constant dense<0.000000e+00> : vector<8x128xf32>
      %41 = vector.multi_reduction <add>, %40, %cst_24 [0] : vector<1x8x128xf32> to vector<8x128xf32>
      %42 = vector.shape_cast %41 : vector<8x128xf32> to vector<1x8x128xf32>
      %43 = arith.addf %36, %42 : vector<1x8x128xf32>
      %c0_25 = arith.constant 0 : index
      %c0_26 = arith.constant 0 : index
      %c0_27 = arith.constant 0 : index
      %44 = vector.load %arg5[%c0_25, %c0_26, %c0_27] : memref<1x8x128xf32, #tpu.memory_space<vmem>>, vector<1x8x128xf32>
      tpu.vector_store %arg5[%c0_25, %c0_26, %c0_27], %43 {strides = array<i32>} : memref<1x8x128xf32, #tpu.memory_space<vmem>>, vector<1x8x128xf32>,
      %c0_28 = arith.constant 0 : index
      %c0_29 = arith.constant 0 : index
      %c0_30 = arith.constant 0 : index
      %45 = vector.load %arg4[%c0_28, %c0_29, %c0_30] : memref<1x8x128xf32, #tpu.memory_space<vmem>>, vector<1x8x128xf32>
      tpu.vector_store %arg4[%c0_28, %c0_29, %c0_30], %32 {strides = array<i32>} : memref<1x8x128xf32, #tpu.memory_space<vmem>>, vector<1x8x128xf32>,
    } else {
    }
    %c1_i32_3 = arith.constant 1 : i32
    %8 = arith.cmpi slt, %1, %c1_i32_3 : i32
    %9 = arith.extui %8 : i1 to i32
    %c0_i32_4 = arith.constant 0 : i32
    %10 = arith.cmpi ne, %9, %c0_i32_4 : i32
    scf.if %10 {
      %c0 = arith.constant 0 : index
      %c0_5 = arith.constant 0 : index
      %11 = vector.load %arg3[%c0, %c0_5] : memref<8x128xf32, #tpu.memory_space<vmem>>, vector<8x128xf32>
      %cst = arith.constant 2.500000e-01 : f32
      %12 = vector.broadcast %cst : f32 to vector<8x128xf32>
      %13 = arith.addf %12, %11 : vector<8x128xf32>
      %cst_6 = arith.constant 0.000000e+00 : f32
      %14 = vector.broadcast %cst_6 : f32 to vector<8x128xf32>
      %15 = arith.maximumf %13, %14 : vector<8x128xf32>
      %cst_7 = arith.constant 6.400000e+01 : f32
      %16 = vector.broadcast %cst_7 : f32 to vector<8x128xf32>
      %17 = arith.mulf %16, %15 : vector<8x128xf32>
      %cst_8 = arith.constant 2.500000e-01 : f32
      %18 = vector.broadcast %cst_8 : f32 to vector<8x128xf32>
      %19 = arith.subf %11, %18 : vector<8x128xf32>
      %20 = arith.mulf %17, %19 : vector<8x128xf32>
      %c0_i32_9 = arith.constant 0 : i32
      %21 = arith.cmpi eq, %1, %c0_i32_9 : i32
      %22 = arith.extui %21 : i1 to i32
      %c0_i32_10 = arith.constant 0 : i32
      %23 = arith.cmpi ne, %22, %c0_i32_10 : i32
      scf.if %23 {
        %46 = tpu.iota {dimensions = array<i32: 0>} : vector<8x128xi32>
        %47 = tpu.iota {dimensions = array<i32: 1>} : vector<8x128xi32>
        %c0_i32_31 = arith.constant 0 : i32
        %48 = vector.broadcast %c0_i32_31 : i32 to vector<8x128xi32>
        %49 = arith.addi %48, %46 : vector<8x128xi32>
        %c128_i32 = arith.constant 128 : i32
        %50 = vector.broadcast %c128_i32 : i32 to vector<8x128xi32>
        %51 = arith.muli %49, %50 : vector<8x128xi32>
        %52 = arith.addi %51, %47 : vector<8x128xi32>
        %c32_i32 = arith.constant 32 : i32
        %53 = vector.broadcast %c32_i32 : i32 to vector<8x128xi32>
        %54 = arith.cmpi slt, %52, %53 : vector<8x128xi32>
        %cst_32 = arith.constant -1.000000e+30 : f32
        %55 = vector.broadcast %cst_32 : f32 to vector<8x128xf32>
        %56 = arith.select %54, %20, %55 : vector<8x128xi1>, vector<8x128xf32>
        %c0_33 = arith.constant 0 : index
        %c0_34 = arith.constant 0 : index
        %57 = vector.load %arg9[%c0_33, %c0_34] : memref<8x128xf32, #tpu.memory_space<vmem>>, vector<8x128xf32>
        tpu.vector_store %arg9[%c0_33, %c0_34], %56 {strides = array<i32>} : memref<8x128xf32, #tpu.memory_space<vmem>>, vector<8x128xf32>,
      } else {
      }
      %c0_i32_11 = arith.constant 0 : i32
      %24 = arith.cmpi ne, %1, %c0_i32_11 : i32
      %25 = arith.extui %24 : i1 to i32
      %c0_i32_12 = arith.constant 0 : i32
      %26 = arith.cmpi ne, %25, %c0_i32_12 : i32
      scf.if %26 {
        %c0_31 = arith.constant 0 : index
        %c0_32 = arith.constant 0 : index
        %46 = vector.load %arg9[%c0_31, %c0_32] : memref<8x128xf32, #tpu.memory_space<vmem>>, vector<8x128xf32>
        tpu.vector_store %arg9[%c0_31, %c0_32], %20 {strides = array<i32>} : memref<8x128xf32, #tpu.memory_space<vmem>>, vector<8x128xf32>,
      } else {
      }
      %c0_13 = arith.constant 0 : index
      %c0_14 = arith.constant 0 : index
      %27 = vector.load %arg9[%c0_13, %c0_14] : memref<8x128xf32, #tpu.memory_space<vmem>>, vector<8x128xf32>
      %28 = vector.shape_cast %27 : vector<8x128xf32> to vector<1x8x128xf32>
      %cst_15 = arith.constant dense<0xFF800000> : vector<8x128xf32>
      %29 = vector.multi_reduction <maximumf>, %28, %cst_15 [0] : vector<1x8x128xf32> to vector<8x128xf32>
      %c0_16 = arith.constant 0 : index
      %c0_17 = arith.constant 0 : index
      %c0_18 = arith.constant 0 : index
      %30 = vector.load %arg6[%c0_16, %c0_17, %c0_18] : memref<1x8x128xf32, #tpu.memory_space<vmem>>, vector<1x8x128xf32>
      %31 = vector.shape_cast %29 : vector<8x128xf32> to vector<1x8x128xf32>
      %32 = arith.maximumf %30, %31 : vector<1x8x128xf32>
      %c0_19 = arith.constant 0 : index
      %c0_20 = arith.constant 0 : index
      %c0_21 = arith.constant 0 : index
      %33 = vector.load %arg7[%c0_19, %c0_20, %c0_21] : memref<1x8x128xf32, #tpu.memory_space<vmem>>, vector<1x8x128xf32>
      %34 = arith.subf %30, %32 : vector<1x8x128xf32>
      %35 = math.exp %34 : vector<1x8x128xf32>
      %36 = arith.mulf %33, %35 : vector<1x8x128xf32>
      %c0_22 = arith.constant 0 : index
      %c0_23 = arith.constant 0 : index
      %37 = vector.load %arg9[%c0_22, %c0_23] : memref<8x128xf32, #tpu.memory_space<vmem>>, vector<8x128xf32>
      %38 = vector.shape_cast %37 : vector<8x128xf32> to vector<1x8x128xf32>
      %39 = arith.subf %38, %32 : vector<1x8x128xf32>
      %40 = math.exp %39 : vector<1x8x128xf32>
      %cst_24 = arith.constant dense<0.000000e+00> : vector<8x128xf32>
      %41 = vector.multi_reduction <add>, %40, %cst_24 [0] : vector<1x8x128xf32> to vector<8x128xf32>
      %42 = vector.shape_cast %41 : vector<8x128xf32> to vector<1x8x128xf32>
      %43 = arith.addf %36, %42 : vector<1x8x128xf32>
      %c0_25 = arith.constant 0 : index
      %c0_26 = arith.constant 0 : index
      %c0_27 = arith.constant 0 : index
      %44 = vector.load %arg7[%c0_25, %c0_26, %c0_27] : memref<1x8x128xf32, #tpu.memory_space<vmem>>, vector<1x8x128xf32>
      tpu.vector_store %arg7[%c0_25, %c0_26, %c0_27], %43 {strides = array<i32>} : memref<1x8x128xf32, #tpu.memory_space<vmem>>, vector<1x8x128xf32>,
      %c0_28 = arith.constant 0 : index
      %c0_29 = arith.constant 0 : index
      %c0_30 = arith.constant 0 : index
      %45 = vector.load %arg6[%c0_28, %c0_29, %c0_30] : memref<1x8x128xf32, #tpu.memory_space<vmem>>, vector<1x8x128xf32>
      tpu.vector_store %arg6[%c0_28, %c0_29, %c0_30], %32 {strides = array<i32>} : memref<1x8x128xf32, #tpu.memory_space<vmem>>, vector<1x8x128xf32>,
    } else {
    }
    return
  }
  func.func @transform_0(%arg0: i32, %arg1: i32) -> (i32, i32) {
    %c1_i32 = arith.constant 1 : i32
    %0 = arith.muli %arg0, %c1_i32 : i32
    %1 = arith.addi %0, %arg1 : i32
    %c0_i32 = arith.constant 0 : i32
    %2 = arith.minsi %1, %c0_i32 : i32
    %c0_i32_0 = arith.constant 0 : i32
    %c0_i32_1 = arith.constant 0 : i32
    return %2, %c0_i32_0 : i32, i32
  }
  func.func @transform_1(%arg0: i32, %arg1: i32) -> (i32, i32) {
    %c1_i32 = arith.constant 1 : i32
    %0 = arith.muli %arg0, %c1_i32 : i32
    %1 = arith.addi %0, %arg1 : i32
    %c0_i32 = arith.constant 0 : i32
    %2 = arith.minsi %1, %c0_i32 : i32
    %c0_i32_0 = arith.constant 0 : i32
    %c0_i32_1 = arith.constant 0 : i32
    return %2, %c0_i32_0 : i32, i32
  }
  func.func @transform_2(%arg0: i32, %arg1: i32) -> (i32, i32, i32) {
    %c0_i32 = arith.constant 0 : i32
    %c0_i32_0 = arith.constant 0 : i32
    %c0_i32_1 = arith.constant 0 : i32
    return %arg0, %c0_i32, %c0_i32_0 : i32, i32, i32
  }
  func.func @transform_3(%arg0: i32, %arg1: i32) -> (i32, i32, i32) {
    %c0_i32 = arith.constant 0 : i32
    %c0_i32_0 = arith.constant 0 : i32
    %c0_i32_1 = arith.constant 0 : i32
    return %arg0, %c0_i32, %c0_i32_0 : i32, i32, i32
  }
  func.func @transform_4(%arg0: i32, %arg1: i32) -> (i32, i32, i32) {
    %c0_i32 = arith.constant 0 : i32
    %c0_i32_0 = arith.constant 0 : i32
    %c0_i32_1 = arith.constant 0 : i32
    return %arg0, %c0_i32, %c0_i32_0 : i32, i32, i32
  }
  func.func @transform_5(%arg0: i32, %arg1: i32) -> (i32, i32, i32) {
    %c0_i32 = arith.constant 0 : i32
    %c0_i32_0 = arith.constant 0 : i32
    %c0_i32_1 = arith.constant 0 : i32
    return %arg0, %c0_i32, %c0_i32_0 : i32, i32, i32
  }
}

</mosaic_0001>

<bundles_post_ra>
// kernel: tpu_custom_call.1
= control target key start
LH: loop header
LB: loop body
LE: loop exit
PB: predicated region body
PF: predicated region fallthrough
CT: control target
= control target key end

     0   :  { %11 = vsyncpa [#allocation5], 0  ;;  %s487_s0 = inlined_call_operand.hbm [shape: f32[1,128], index: 0, kind: input, shape index: {}]   ;;  %s488_s1 = inlined_call_operand.vmem [shape: f32[1,128], index: 1, kind: input, shape index: {}]   ;;  %s489_s2 = inlined_call_operand.hbm [shape: f32[1,8,128], index: 2, kind: output, shape index: {0}]   ;;  %s490_s3 = inlined_call_operand.hbm [shape: f32[1,8,128], index: 3, kind: output, shape index: {1}]   ;;  %s491_s4 = inlined_call_operand.hbm [shape: f32[1,8,128], index: 4, kind: output, shape index: {2}]   ;;  %s492_s5 = inlined_call_operand.hbm [shape: f32[1,8,128], index: 5, kind: output, shape index: {3}]  }
   0x1   :  { %12 = vsyncpa [#allocation6], 0 }
   0x2   :  { %13 = vsyncpa [#allocation9], 0 }
   0x3   :  { %14 = vsyncpa [#allocation12], 0 }
   0x4   :  { %25 = vsyncadd [#allocation5], 112  ;;  %s373_s18 = smov [#allocation4]   ;;  %s255_s22 = scalar_lea.hbm %s487_s0, 16 }
   0x5   :  { %s29_s19 = sshll.u32 %s373_s18, 4  ;;  %p256_p0 = scmp.ne.s32.totalorder %s487_s0, %s255_s22  ;;  %s30_s19 = int_to_ptr.vmem [resolvable:$true] %s29_s19 }
   0x6   :  { %p259_p1 = scmp.lt.u32.totalorder %s255_s22, %s487_s0 }
   0x8   :  { %p261_p2 = pnand %p259_p1, %p256_p0 }
   0xa   :  { %264 = shalt.err (!%p261_p2)
}
   0xb   :  { %s265_s27 = scalar_lea.vmem %s30_s19, 16  ;;  %s269_s28 = scalar_lea.vmem %s30_s19, 128 }
   0xc   :  { %p266_p3 = scmp.ne.s32.totalorder %s30_s19, %s265_s27  ;;  %p270_p4 = scmp.lt.s32.totalorder %s30_s19, %s30_s19 }
   0xd   :  { %p271_p5 = scmp.lt.s32.totalorder %s269_s28, %s265_s27 }
   0xf   :  { %p272_p6 = por %p271_p5, %p270_p4 }
  0x11   :  { %p273_p7 = pnand %p272_p6, %p266_p3 }
  0x13   :  { %276 = shalt.err (!%p273_p7)
}
  0x14   :  { %s374_s29 = smov 16   ;;  %s375_s30 = smov 1  }
  0x15   :  { %35 = dma.hbm_to_vmem [thread:$0]  %s487_s0, 16, %s30_s19, [#allocation5], %s374_s29, %s374_s29, %s375_s30  }
  0x16   :  { %365 = dma.done.wait [#allocation5], 128  }
  0x17   :  { %366 = vsyncadd [#allocation5], 4294967168  ;;  %v109_v0 = vlaneseq  ;;  %v99_v4 = vld [vmem:[#allocation4] sm:$0xff]  ;;  %s376_s0 = smov [#allocation7]  }
  0x18   :  { %v138_v5 = vld [vmem:[%s488_s1] sm:$0xff]  ;;  %v100_v6 = vsub.f32 1.25, %v99_v4  ;;  %v236_v10 = vadd.f32 -0.75, %v99_v4  ;;  %s181_s10 = sshll.u32 %s376_s0, 4  ;;  %s182_s10 = int_to_ptr.vmem [resolvable:$true] %s181_s10 }
  0x19   :  { %v110_v1 = vshrl.u32 %v109_v0, 7  ;;  %v112_v2 = vand.u32 127, %v109_v0  ;;  %v139_v7 = vadd.f32 0.25, %v138_v5  ;;  %v237_v12 = vadd.f32 -0.25, %v138_v5  ;;  %s277_s1 = scalar_lea.vmem %s182_s10, 128  ;;  %p282_p9 = scmp.lt.s32.totalorder %s182_s10, %s182_s10 }
  0x1a   :  { %v101_v9 = vmax.f32 %v100_v6, 0.0  ;;  %p278_p8 = scmp.ne.s32.totalorder %s182_s10, %s277_s1  ;;  %p283_p10 = scmp.lt.s32.totalorder %s277_s1, %s277_s1 }
  0x1b   :  { %v113_v3 = vmul.u32 128, %v110_v1  ;;  %v140_v11 = vmax.f32 %v139_v7, 0.0 }
  0x1c   :  { %v102_v13 = vmul.f32 -64.0, %v101_v9  ;;  %p284_p11 = por %p283_p10, %p282_p9 }
  0x1d   :  { %v114_v8 = vadd.s32 %v113_v3, %v112_v2  ;;  %v141_v14 = vmul.f32 64.0, %v140_v11 }
  0x1e   :  { %v104_v15 = vmul.f32 %v236_v10, %v102_v13  ;;  %p285_p12 = pnand %p284_p11, %p278_p8 }
  0x1f   :  { %vm115_vm0 = vcmp.lt.s32.totalorder %v114_v8, 8  ;;  %vm153_vm1 = vcmp.lt.s32.totalorder %v114_v8, 32  ;;  %v143_v16 = vmul.f32 %v237_v12, %v141_v14 }
  0x20   :  { %v116_v17 = vsel %vm115_vm0, %v104_v15, -1e+30 }
  0x21   :  { %v154_v18 = vsel %vm153_vm1, %v143_v16, -1e+30  ;;  %v125_v19 = vmax.f32 %v116_v17, -1e+30 }
  0x22   :  { %v162_v20 = vmax.f32 %v154_v18, -1e+30 }
  0x23   :  { %v127_v21 = vsub.f32 -1e+30, %v125_v19  ;;  %v131_v22 = vsub.f32 %v116_v17, %v125_v19  ;;  %137 = vst [vmem:[#allocation7] sm:$0xff] %v125_v19 }
  0x24   :  { %v164_v23 = vsub.f32 -1e+30, %v162_v20  ;;  %v168_v24 = vsub.f32 %v154_v18, %v162_v20  ;;  %174 = vst [vmem:[#allocation10] sm:$0xff] %v162_v20 }
  0x25   :  { %288 = shalt.err (!%p285_p12)
}
  0x26   :  { %s289_s13 = scalar_lea.hbm %s489_s2, 128 }
  0x27   :  { %p290_p13 = scmp.ne.s32.totalorder %s489_s2, %s289_s13  ;;  %p293_p0 = scmp.lt.u32.totalorder %s289_s13, %s489_s2 }
  0x29   :  { %p295_p1 = pnand %p293_p0, %p290_p13 }
  0x2b   :  { %298 = shalt.err (!%p295_p1)
}
  0x2c   :  { %184 = dma.vmem_to_hbm [thread:$0]  %s182_s10, 128, %s489_s2, [#allocation6]   ;;  %v128_v25 = vmul.f32 1.442695, %v127_v21  ;;  %v132_v26 = vmul.f32 1.442695, %v131_v22 }
  0x2d   :  { %v165_v27 = vmul.f32 1.442695, %v164_v23  ;;  %v169_v28 = vmul.f32 1.442695, %v168_v24  ;;  %s377_s20 = smov [#allocation8]   ;;  %s378_s22 = smov [#allocation10]  }
  0x2e   :  { %247 = vpow2.f32 %v128_v25  ;;  %s191_s21 = sshll.u32 %s377_s20, 4  ;;  %s201_s23 = sshll.u32 %s378_s22, 4  ;;  %s192_s21 = int_to_ptr.vmem [resolvable:$true] %s191_s21  ;;  %s437_s23 = int_to_ptr.vmem [resolvable:$true] %s201_s23 }
  0x2f   :  { %249 = vpow2.f32 %v132_v26  ;;  %s379_s24 = smov [#allocation11]   ;;  %s299_s2 = scalar_lea.vmem %s192_s21, 128 }
  0x30   :  { %251 = vpow2.f32 %v165_v27  ;;  %s211_s25 = sshll.u32 %s379_s24, 4  ;;  %p300_p2 = scmp.ne.s32.totalorder %s192_s21, %s299_s2  ;;  %s439_s25 = int_to_ptr.vmem [resolvable:$true] %s211_s25 }
  0x31   :  { %253 = vpow2.f32 %v169_v28  ;;  %p304_p3 = scmp.lt.s32.totalorder %s192_s21, %s192_s21  ;;  %p305_p4 = scmp.lt.s32.totalorder %s299_s2, %s299_s2 }
  0x33   :  { %p306_p5 = por %p305_p4, %p304_p3 }
  0x35   :  { %p307_p6 = pnand %p306_p5, %p300_p2 }
  0x38   :  { %v248_v29 = vpop.eup %247 }
  0x39   :  { %v250_v30 = vpop.eup %249  ;;  %v130_v31 = vmul.f32 0.0, %v248_v29 }
  0x3a   :  { %v252_v32 = vpop.eup %251 }
  0x3b   :  { %v254_v33 = vpop.eup %253  ;;  %v135_v34 = vadd.f32 %v250_v30, %v130_v31  ;;  %v167_v35 = vmul.f32 0.0, %v252_v32 }
  0x3d   :  { %136 = vst [vmem:[#allocation8] sm:$0xff] %v135_v34  ;;  %v172_v36 = vadd.f32 %v254_v33, %v167_v35 }
  0x3e   :  { %310 = shalt.err (!%p307_p6)
}
  0x3f   :  { %s311_s28 = scalar_lea.hbm %s490_s3, 128 }
  0x40   :  { %p312_p7 = scmp.ne.s32.totalorder %s490_s3, %s311_s28  ;;  %p315_p8 = scmp.lt.u32.totalorder %s311_s28, %s490_s3 }
  0x42   :  { %p317_p9 = pnand %p315_p8, %p312_p7 }
  0x44   :  { %320 = shalt.err (!%p317_p9)
}
  0x45   :  { %194 = dma.vmem_to_hbm [thread:$0]  %s192_s21, 128, %s490_s3, [#allocation9]   ;;  %173 = vst [vmem:[#allocation11] sm:$0xff] %v172_v36 }
  0x46   :  { %s321_s0 = scalar_lea.vmem %s437_s23, 128  ;;  %p326_p11 = scmp.lt.s32.totalorder %s437_s23, %s437_s23 }
  0x47   :  { %p322_p10 = scmp.ne.s32.totalorder %s437_s23, %s321_s0  ;;  %p327_p12 = scmp.lt.s32.totalorder %s321_s0, %s321_s0 }
  0x49   :  { %p328_p13 = por %p327_p12, %p326_p11 }
  0x4b   :  { %p329_p0 = pnand %p328_p13, %p322_p10 }
  0x4d   :  { %332 = shalt.err (!%p329_p0)
}
  0x4e   :  { %s333_s11 = scalar_lea.hbm %s491_s4, 128 }
  0x4f   :  { %p334_p1 = scmp.ne.s32.totalorder %s491_s4, %s333_s11  ;;  %p337_p2 = scmp.lt.u32.totalorder %s333_s11, %s491_s4 }
  0x51   :  { %p339_p3 = pnand %p337_p2, %p334_p1 }
  0x53   :  { %342 = shalt.err (!%p339_p3)
}
  0x54   :  { %204 = dma.vmem_to_hbm [thread:$0]  %s437_s23, 128, %s491_s4, [#allocation9]  }
  0x55   :  { %s343_s17 = scalar_lea.vmem %s439_s25, 128  ;;  %p348_p5 = scmp.lt.s32.totalorder %s439_s25, %s439_s25 }
  0x56   :  { %p344_p4 = scmp.ne.s32.totalorder %s439_s25, %s343_s17  ;;  %p349_p6 = scmp.lt.s32.totalorder %s343_s17, %s343_s17 }
  0x58   :  { %p350_p7 = por %p349_p6, %p348_p5 }
  0x5a   :  { %p351_p8 = pnand %p350_p7, %p344_p4 }
  0x5c   :  { %354 = shalt.err (!%p351_p8)
}
  0x5d   :  { %s355_s20 = scalar_lea.hbm %s492_s5, 128 }
  0x5e   :  { %p356_p9 = scmp.ne.s32.totalorder %s492_s5, %s355_s20  ;;  %p359_p10 = scmp.lt.u32.totalorder %s355_s20, %s492_s5 }
  0x60   :  { %p361_p11 = pnand %p359_p10, %p356_p9 }
  0x62   :  { %364 = shalt.err (!%p361_p11)
}
  0x63   :  { %214 = dma.vmem_to_hbm [thread:$0]  %s439_s25, 128, %s492_s5, [#allocation12]  }
  0x64   :  { %367 = dma.done.wait [#allocation6], 128  }
  0x65   :  { %368 = vsyncadd [#allocation6], 4294967168 }
  0x66   :  { %369 = dma.done.wait [#allocation9], 256  }
  0x67   :  { %370 = vsyncadd [#allocation9], 4294967040 }
  0x68   :  { %371 = dma.done.wait [#allocation12], 128  }
  0x69   :  { %372 = vsyncadd [#allocation12], 4294967168 }
  0x6a   :  { %227 = vsyncpa [#allocation5], 1 }
  0x6b   :  { %228 = vsyncpa [#allocation6], 1 }
  0x6c   :  { %229 = vsyncpa [#allocation9], 1 }
  0x6d   :  { %230 = vsyncpa [#allocation12], 1 }

</bundles_post_ra>
